<compile_context>
chip_gen: v7x
topology: tpu7x:2x2x1
jax: 0.10.0
libtpu: 0.0.40
codegen_flags: <defaults>
</compile_context>

<pallas_src>
import jax
import jax.numpy as jnp
from jax.experimental import pallas as pl
from jax.experimental.pallas import tpu as pltpu


def mlp_kernel(x_ref, w1_ref, b1_ref, w2_ref, b2_ref, o_ref):
    # fc1: [TM, D_in] @ [D_in, H] (bf16 operands, f32 accumulation on MXU)
    h = jnp.dot(x_ref[...].astype(jnp.bfloat16), w1_ref[...],
                preferred_element_type=jnp.float32)
    h = jnp.maximum(h + b1_ref[...], 0.0)          # bias + ReLU in f32 (VPU)
    # fc2: [TM, H] @ [H, D_out]
    y = jnp.dot(h.astype(jnp.bfloat16), w2_ref[...],
                preferred_element_type=jnp.float32)
    o_ref[...] = (y + b2_ref[...]).astype(o_ref.dtype)


def _round_up(n, m):
    return ((n + m - 1) // m) * m


def mlp_forward(x, w1, b1, w2, b2, *, tm=256):
    """x: [B, D_in], w1: [D_in, H], b1: [H], w2: [H, D_out], b2: [D_out].

    Weights are stored transposed vs nn.Linear (so the kernel does x @ W).
    """
    B, D_in = x.shape
    H = w1.shape[1]
    D_out = w2.shape[1]

    # Lane-dense padding for all feature dims; batch padded to the tile size.
    D_in_p = _round_up(D_in, 128)
    H_p = _round_up(H, 128)
    D_out_p = _round_up(D_out, 128)
    tm = min(tm, _round_up(B, 8))
    B_p = _round_up(B, tm)

    xp = jnp.zeros((B_p, D_in_p), x.dtype).at[:B, :D_in].set(x)
    w1p = jnp.zeros((D_in_p, H_p), jnp.bfloat16).at[:D_in, :H].set(
        w1.astype(jnp.bfloat16))
    b1p = jnp.zeros((1, H_p), jnp.float32).at[0, :H].set(
        b1.astype(jnp.float32))
    w2p = jnp.zeros((H_p, D_out_p), jnp.bfloat16).at[:H, :D_out].set(
        w2.astype(jnp.bfloat16))
    b2p = jnp.zeros((1, D_out_p), jnp.float32).at[0, :D_out].set(
        b2.astype(jnp.float32))

    out = pl.pallas_call(
        mlp_kernel,
        out_shape=jax.ShapeDtypeStruct((B_p, D_out_p), x.dtype),
        grid_spec=pltpu.PrefetchScalarGridSpec(
            num_scalar_prefetch=0,
            grid=(B_p // tm,),
            in_specs=[
                pl.BlockSpec((tm, D_in_p), lambda i: (i, 0)),     # x tile
                pl.BlockSpec((D_in_p, H_p), lambda i: (0, 0)),    # w1 resident
                pl.BlockSpec((1, H_p), lambda i: (0, 0)),         # b1 resident
                pl.BlockSpec((H_p, D_out_p), lambda i: (0, 0)),   # w2 resident
                pl.BlockSpec((1, D_out_p), lambda i: (0, 0)),     # b2 resident
            ],
            out_specs=pl.BlockSpec((tm, D_out_p), lambda i: (i, 0)),
        ),
        compiler_params=pltpu.CompilerParams(
            dimension_semantics=("parallel",)),
    )(xp, w1p, b1p, w2p, b2p)

    return out[:B, :D_out]


if __name__ == "__main__":
    # Small MLP sizes consistent with the module; batch large enough to
    # exercise the batch-tiled grid (512 rows / 256-row tiles -> 2 grid steps).
    B, D_in, H, D_out = 512, 32, 64, 16

    key = jax.random.PRNGKey(0)
    kx, kw1, kb1, kw2, kb2 = jax.random.split(key, 5)

    x = jax.random.normal(kx, (B, D_in), dtype=jnp.float32)
    # nn.Linear-style uniform(-1/sqrt(fan_in), 1/sqrt(fan_in)) init.
    w1 = jax.random.uniform(kw1, (D_in, H), minval=-1.0, maxval=1.0,
                            dtype=jnp.float32) / jnp.sqrt(D_in)
    b1 = jax.random.uniform(kb1, (H,), minval=-1.0, maxval=1.0,
                            dtype=jnp.float32) / jnp.sqrt(D_in)
    w2 = jax.random.uniform(kw2, (H, D_out), minval=-1.0, maxval=1.0,
                            dtype=jnp.float32) / jnp.sqrt(H)
    b2 = jax.random.uniform(kb2, (D_out,), minval=-1.0, maxval=1.0,
                            dtype=jnp.float32) / jnp.sqrt(H)

    out = jax.block_until_ready(mlp_forward(x, w1, b1, w2, b2))
    assert out.shape == (B, D_out)

    # Reference 1: same bf16-operand / f32-accumulation math as the kernel.
    h_ref = jnp.maximum(
        jnp.dot(x.astype(jnp.bfloat16), w1.astype(jnp.bfloat16),
                preferred_element_type=jnp.float32) + b1, 0.0)
    ref_bf16 = jnp.dot(h_ref.astype(jnp.bfloat16), w2.astype(jnp.bfloat16),
                       preferred_element_type=jnp.float32) + b2
    assert jnp.allclose(out, ref_bf16, atol=1e-3, rtol=1e-3)

    # Reference 2: pure f32 forward (loose tolerance for bf16 operand rounding).
    ref_f32 = jnp.maximum(x @ w1 + b1, 0.0) @ w2 + b2
    assert jnp.allclose(out, ref_f32, atol=5e-2, rtol=5e-2)

    print("KERNEL_OK")
</pallas_src>

<mosaic_0001>
module attributes {stable_mosaic.version = 11 : i64} {
  func.func @mlp_kernel(%arg0: i32, %arg1: memref<256x128xf32, #tpu.memory_space<vmem>>, %arg2: memref<128x128xbf16, #tpu.memory_space<vmem>>, %arg3: memref<1x128xf32, #tpu.memory_space<vmem>>, %arg4: memref<128x128xbf16, #tpu.memory_space<vmem>>, %arg5: memref<1x128xf32, #tpu.memory_space<vmem>>, %arg6: memref<256x128xf32, #tpu.memory_space<vmem>>) attributes {dimension_semantics = [#tpu.dimension_semantics<parallel>], iteration_bounds = array<i64: 2>, scalar_prefetch = 0 : i64, scratch_operands = 0 : i64, tpu.core_type = #tpu.core_type<tc>, window_params = [{transform_indices = @transform_0, window_bounds = array<i64: 256, 128>}, {pipeline_mode = #tpu.pipeline_mode<synchronous>, transform_indices = @transform_1, window_bounds = array<i64: 128, 128>}, {pipeline_mode = #tpu.pipeline_mode<synchronous>, transform_indices = @transform_2, window_bounds = array<i64: 1, 128>}, {pipeline_mode = #tpu.pipeline_mode<synchronous>, transform_indices = @transform_3, window_bounds = array<i64: 128, 128>}, {pipeline_mode = #tpu.pipeline_mode<synchronous>, transform_indices = @transform_4, window_bounds = array<i64: 1, 128>}, {transform_indices = @transform_5, window_bounds = array<i64: 256, 128>}]} {
    %c0 = arith.constant 0 : index
    %c0_0 = arith.constant 0 : index
    %0 = vector.load %arg1[%c0, %c0_0] : memref<256x128xf32, #tpu.memory_space<vmem>>, vector<256x128xf32>
    %1 = arith.truncf %0 : vector<256x128xf32> to vector<256x128xbf16>
    %c0_1 = arith.constant 0 : index
    %c0_2 = arith.constant 0 : index
    %2 = vector.load %arg2[%c0_1, %c0_2] : memref<128x128xbf16, #tpu.memory_space<vmem>>, vector<128x128xbf16>
    %cst = arith.constant dense<0.000000e+00> : vector<256x128xf32>
    %3 = tpu.matmul %1, %2, %cst {dimension_numbers = #tpu.dot_dimension_numbers<[1], [0], [0], [1], [0, 0, 1, 1], [], []>} : vector<256x128xbf16>, vector<128x128xbf16>, vector<256x128xf32> -> vector<256x128xf32>
    %c0_3 = arith.constant 0 : index
    %c0_4 = arith.constant 0 : index
    %4 = vector.load %arg3[%c0_3, %c0_4] : memref<1x128xf32, #tpu.memory_space<vmem>>, vector<1x128xf32>
    %5 = vector.broadcast %4 : vector<1x128xf32> to vector<256x128xf32>
    %6 = arith.addf %3, %5 : vector<256x128xf32>
    %cst_5 = arith.constant 0.000000e+00 : f32
    %7 = vector.broadcast %cst_5 : f32 to vector<256x128xf32>
    %8 = arith.maximumf %6, %7 : vector<256x128xf32>
    %9 = arith.truncf %8 : vector<256x128xf32> to vector<256x128xbf16>
    %c0_6 = arith.constant 0 : index
    %c0_7 = arith.constant 0 : index
    %10 = vector.load %arg4[%c0_6, %c0_7] : memref<128x128xbf16, #tpu.memory_space<vmem>>, vector<128x128xbf16>
    %cst_8 = arith.constant dense<0.000000e+00> : vector<256x128xf32>
    %11 = tpu.matmul %9, %10, %cst_8 {dimension_numbers = #tpu.dot_dimension_numbers<[1], [0], [0], [1], [0, 0, 1, 1], [], []>} : vector<256x128xbf16>, vector<128x128xbf16>, vector<256x128xf32> -> vector<256x128xf32>
    %c0_9 = arith.constant 0 : index
    %c0_10 = arith.constant 0 : index
    %12 = vector.load %arg5[%c0_9, %c0_10] : memref<1x128xf32, #tpu.memory_space<vmem>>, vector<1x128xf32>
    %13 = vector.broadcast %12 : vector<1x128xf32> to vector<256x128xf32>
    %14 = arith.addf %11, %13 : vector<256x128xf32>
    %c0_11 = arith.constant 0 : index
    %c0_12 = arith.constant 0 : index
    %15 = vector.load %arg6[%c0_11, %c0_12] : memref<256x128xf32, #tpu.memory_space<vmem>>, vector<256x128xf32>
    tpu.vector_store %arg6[%c0_11, %c0_12], %14 {strides = array<i32>} : memref<256x128xf32, #tpu.memory_space<vmem>>, vector<256x128xf32>,
    return
  }
  func.func @transform_0(%arg0: i32) -> (i32, i32) {
    %c0_i32 = arith.constant 0 : i32
    %c0_i32_0 = arith.constant 0 : i32
    return %arg0, %c0_i32 : i32, i32
  }
  func.func @transform_1(%arg0: i32) -> (i32, i32) {
    %c0_i32 = arith.constant 0 : i32
    %c0_i32_0 = arith.constant 0 : i32
    %c0_i32_1 = arith.constant 0 : i32
    return %c0_i32, %c0_i32_0 : i32, i32
  }
  func.func @transform_2(%arg0: i32) -> (i32, i32) {
    %c0_i32 = arith.constant 0 : i32
    %c0_i32_0 = arith.constant 0 : i32
    %c0_i32_1 = arith.constant 0 : i32
    return %c0_i32, %c0_i32_0 : i32, i32
  }
  func.func @transform_3(%arg0: i32) -> (i32, i32) {
    %c0_i32 = arith.constant 0 : i32
    %c0_i32_0 = arith.constant 0 : i32
    %c0_i32_1 = arith.constant 0 : i32
    return %c0_i32, %c0_i32_0 : i32, i32
  }
  func.func @transform_4(%arg0: i32) -> (i32, i32) {
    %c0_i32 = arith.constant 0 : i32
    %c0_i32_0 = arith.constant 0 : i32
    %c0_i32_1 = arith.constant 0 : i32
    return %c0_i32, %c0_i32_0 : i32, i32
  }
  func.func @transform_5(%arg0: i32) -> (i32, i32) {
    %c0_i32 = arith.constant 0 : i32
    %c0_i32_0 = arith.constant 0 : i32
    return %arg0, %c0_i32 : i32, i32
  }
}

</mosaic_0001>

<bundles_post_ra>
// kernel: tpu_custom_call.1
= control target key start
LH: loop header
LB: loop body
LE: loop exit
PB: predicated region body
PF: predicated region fallthrough
CT: control target
= control target key end

     0   :  { %10 = vsyncpa [#allocation3], 0  ;;  %s1823_s0 = inlined_call_operand.hbm [shape: f32[512,128], index: 0, kind: input, shape index: {}]   ;;  %s1824_s1 = inlined_call_operand.hbm [shape: bf16[128,128], index: 1, kind: input, shape index: {}]   ;;  %s1825_s2 = inlined_call_operand.vmem [shape: f32[1,128], index: 2, kind: input, shape index: {}]   ;;  %s1826_s3 = inlined_call_operand.hbm [shape: bf16[128,128], index: 3, kind: input, shape index: {}]   ;;  %s1827_s4 = inlined_call_operand.vmem [shape: f32[1,128], index: 4, kind: input, shape index: {}]   ;;  %s1828_s5 = inlined_call_operand.hbm [shape: f32[512,128], index: 5, kind: output, shape index: {}]  }
   0x1   :  { %12 = vsyncpa [#allocation3 + $0x1], 0 }
   0x2   :  { %13 = vsyncpa [#allocation6], 0 }
   0x3   :  { %14 = vsyncpa [#allocation4], 0 }
   0x4   :  { %16 = vsyncpa [#allocation4 + $0x1], 0  ;;  %s1442_s18 = smov 0   ;;  %s1444_s19 = smov 0  }
   0x5   :  { %s1446_s20 = smov 0   ;;  %s1448_s21 = smov 0  }
   0x6 LB: > { %s1463_s22 = sadd.s32 4294967295, %s1400_s21   ;;  %s973_s23 = sadd.s32 4294967294, %s1400_s21   ;;  %s1400_s21 = sphi %s1448_s21, %s1848_s21   ;;  %s1396_s20 = sphi %s1446_s20, %s1847_s20   ;;  %s1392_s19 = sphi %s1444_s19, %s1846_s19   ;;  %s1388_s18 = sphi %s1442_s18, %s1845_s18  }
   0x7   : > { %p42_p0 = scmp.ne.s32.totalorder %s1392_s19, %s1388_s18  ;;  %p1829_p1 = scmp.eq.s32.totalorder %s1463_s22, 0 }
   0x8   : > { %p156_p3 = scmp.eq.s32.totalorder %s973_s23, 1  ;;  %p974_p5 = scmp.ge.s32.totalorder %s1400_s21, 1 }
   0x9   : > { %p1472_p4 = por %p1829_p1, %p42_p0  ;;  %p163_p7 = scmp.lt.s32.totalorder %s1400_s21, 3 }
   0xa   : > { %p1477_p6 = por %p156_p3, %p42_p0  ;;  %s1402_s27 = smov [#allocation5]  }
   0xb   : > { %s1832_s24 = scalar_select %p1472_p4, 1, 0 }
   0xc   : > { %s1833_s25 = scalar_select %p1477_p6, 1, 0 }
   0xd   : > { %p1482_p8 = pnand %p974_p5, %p163_p7  ;;  %s175_s28 = sshll.u32 %s1402_s27, 4  ;;  %s1486_s28 = int_to_ptr.vmem [resolvable:$true] %s175_s28 }
   0xe   : > { %s1403_s30 = smov [#allocation7]   ;;  %s1244_s9 = scalar_lea.hbm %s1824_s1, 1024 }
   0xf   : > { %p1167_p9 = pneg %p1482_p8  ;;  %s191_s6 = sshll.u32 %s1403_s30, 4  ;;  %s1497_s6 = int_to_ptr.vmem [resolvable:$true] %s191_s6 }
  0x10   : > { %p1245_p12 = scmp.ne.s32.totalorder %s1824_s1, %s1244_s9  ;;  %p1251_p5 = scmp.lt.u32.totalorder %s1244_s9, %s1824_s1 }
  0x11   : > { %p1493_p11 = pnand %p1167_p9, %p1829_p1 }
  0x13   : > { %p1246_p13 = pneg %p1493_p11 }
  0x15   : > { %p1247_p0 = pnand %p1246_p13, %p1245_p12 }
  0x17   : > { %p1248_p3 = pneg %p1247_p0 }
  0x19   : > { %p1253_p7 = pnand %p1251_p5, %p1248_p3 }
  0x1b   : > { %1256 = shalt.err (!%p1253_p7)
}
  0x1c   : > { %s1257_s14 = scalar_lea.vmem %s1486_s28, 1024  ;;  %p1265_p2 = scmp.lt.s32.totalorder %s1486_s28, %s1486_s28 }
  0x1d   : > { %p1258_p9 = scmp.ne.s32.totalorder %s1486_s28, %s1257_s14  ;;  %p1266_p12 = scmp.lt.s32.totalorder %s1257_s14, %s1257_s14 }
  0x1f   : > { %p1260_p10 = pnand %p1258_p9, %p1246_p13  ;;  %p1267_p0 = por %p1266_p12, %p1265_p2 }
  0x21   : > { %p1261_p1 = pneg %p1260_p10 }
  0x23   : > { %p1268_p6 = pnand %p1267_p0, %p1261_p1 }
  0x25   : > { %1271 = shalt.err (!%p1268_p6)
}
  0x26   : > { %s1404_s15 = smov 64   ;;  %s1405_s16 = smov 4  }
  0x27   : > { %1170 = dma.hbm_to_vmem [thread:$0]  (!%p1493_p11), %s1824_s1, 1024, %s1486_s28, [#allocation6], %s1404_s15, %s1404_s15, %s1405_s16  }
  0x28   : > { %s1272_s7 = scalar_lea.hbm %s1826_s3, 1024 }
  0x29   : > { %p1273_p2 = scmp.ne.s32.totalorder %s1826_s3, %s1272_s7  ;;  %p1279_p10 = scmp.lt.u32.totalorder %s1272_s7, %s1826_s3 }
  0x2b   : > { %p1275_p1 = pnand %p1273_p2, %p1246_p13 }
  0x2d   : > { %p1276_p6 = pneg %p1275_p1 }
  0x2f   : > { %p1281_p3 = pnand %p1279_p10, %p1276_p6 }
  0x31   : > { %1284 = shalt.err (!%p1281_p3)
}
  0x32   : > { %s1285_s28 = scalar_lea.vmem %s1497_s6, 1024  ;;  %p1293_p12 = scmp.lt.s32.totalorder %s1497_s6, %s1497_s6 }
  0x33   : > { %p1286_p5 = scmp.ne.s32.totalorder %s1497_s6, %s1285_s28  ;;  %p1294_p0 = scmp.lt.s32.totalorder %s1285_s28, %s1285_s28 }
  0x35   : > { %p1288_p7 = pnand %p1286_p5, %p1246_p13  ;;  %p1295_p2 = por %p1294_p0, %p1293_p12 }
  0x37   : > { %p1289_p9 = pneg %p1288_p7 }
  0x39   : > { %p1296_p1 = pnand %p1295_p2, %p1289_p9 }
  0x3b   : > { %1299 = shalt.err (!%p1296_p1)
}
  0x3c   : > { %1173 = dma.hbm_to_vmem [thread:$0]  (!%p1493_p11), %s1826_s3, 1024, %s1497_s6, [#allocation6], %s1404_s15, %s1404_s15, %s1405_s16  }
  0x3d   : > { %s1552_s14 = sadd.s32 1, %s1400_s21   ;;  %s29_s29 = sadd.s32 1, %s1396_s20 }
  0x3e   : > { %s26_s17 = ssub.s32 %s1400_s21, %s1552_s14  ;;  %p36_p13 = scmp.ne.s32.totalorder %s1396_s20, %s1392_s19 }
  0x3f   : > { %p27_p6 = scmp.eq.s32.totalorder %s26_s17, 0  ;;  %p37_p10 = scmp.eq.s32.totalorder %s1400_s21, 0 }
  0x40   : > { %p1836_p3 = scmp.eq.s32.totalorder %s1463_s22, 1  ;;  %p1184_p7 = scmp.lt.s32.totalorder %s1400_s21, 2 }
  0x41   : > { %s1568_s27 = scalar_select %p27_p6, %s1396_s20, %s29_s29  }
  0x42   : > { %p1562_p5 = por %p1836_p3, %p36_p13  ;;  %p38_p9 = por %p37_p10, %p36_p13 }
  0x43   : > { %s208_s30 = sand.u32 1, %s1396_s20   ;;  %s1009_s6 = sshll.u32 %s1400_s21, 12 }
  0x44   : > { %s1837_s23 = scalar_select %p1562_p5, 1, 0 }
  0x45   : > { %s978_s7 = sshll.u32 %s208_s30, 8  ;;  %s1575_s8 = scalar_lea.hbm %s1823_s0, %s1009_s6 }
  0x46   : > { %s212_s9 = scalar_lea.vmem [#allocation2], %s978_s7  ;;  %p1579_p11 = pnand %p1184_p7, %p38_p9 }
  0x47   : > { %s219_s10 = sshll.u32 %s212_s9, 4  ;;  %s1583_s28 = scalar_lea.sflag [#allocation3], %s208_s30  ;;  %s1577_s10 = int_to_ptr.vmem [resolvable:$true] %s219_s10 }
  0x48   : > { %s1300_s12 = scalar_lea.hbm %s1575_s8, 4096  ;;  %p1302_p0 = pneg %p1579_p11 }
  0x49   : > { %p1301_p12 = scmp.ne.s32.totalorder %s1575_s8, %s1300_s12  ;;  %s1305_s17 = scalar_lea.hbm %s1823_s0, 8192 }
  0x4a   : > { %p1306_p13 = scmp.lt.u32.totalorder %s1575_s8, %s1823_s0  ;;  %p1307_p6 = scmp.lt.u32.totalorder %s1305_s17, %s1300_s12 }
  0x4b   : > { %p1303_p2 = pnand %p1302_p0, %p1301_p12  ;;  %p1309_p3 = scmp.lt.u32.totalorder %s1300_s12, %s1575_s8 }
  0x4c   : > { %p1308_p10 = por %p1307_p6, %p1306_p13 }
  0x4d   : > { %p1304_p1 = pneg %p1303_p2 }
  0x4e   : > { %p1310_p7 = por %p1309_p3, %p1308_p10 }
  0x50   : > { %p1311_p9 = pnand %p1310_p7, %p1304_p1 }
  0x52   : > { %1314 = shalt.err (!%p1311_p9)
}
  0x53   : > { %s1315_s30 = scalar_lea.vmem %s1577_s10, 4096  ;;  %s1406_s15 = smov [#allocation2]  }
  0x54   : > { %p1316_p12 = scmp.ne.s32.totalorder %s1577_s10, %s1315_s30  ;;  %s1320_s16 = sshll.u32 %s1406_s15, 4  ;;  %s1321_s16 = int_to_ptr.vmem [resolvable:$false] %s1320_s16 }
  0x55   : > { %s1322_s9 = scalar_lea.vmem %s1321_s16, 8192  ;;  %p1323_p4 = scmp.lt.s32.totalorder %s1577_s10, %s1321_s16 }
  0x56   : > { %p1318_p2 = pnand %p1316_p12, %p1302_p0  ;;  %p1324_p13 = scmp.lt.s32.totalorder %s1322_s9, %s1315_s30 }
  0x58   : > { %p1319_p5 = pneg %p1318_p2  ;;  %p1325_p6 = por %p1324_p13, %p1323_p4 }
  0x5a   : > { %p1326_p10 = pnand %p1325_p6, %p1319_p5 }
  0x5c   : > { %1329 = shalt.err (!%p1326_p10)
}
  0x5d   : > { %s1407_s12 = smov 128   ;;  %s1408_s13 = smov 8  }
  0x5e   : > { %1177 = dma.hbm_to_vmem [thread:$0]  (!%p1579_p11), %s1575_s8, 4096, %s1577_s10, %s1583_s28, %s1407_s12, %s1407_s12, %s1408_s13  }
  0x5f   : > { %231 = sbr.rel (%p1482_p8) target bundleno = 649 (0x289), region = 40  ;;  %s1614_s29 = sand.u32 (!%p1482_p8), 1, %s1392_s19  }
  0x60   : > { %s982_s17 = sshll.u32 (!%p1482_p8), %s1614_s29, 8  ;;  %s234_s7 = scalar_lea.sflag (!%p1482_p8), [#allocation3], %s1614_s29 }
  0x61   : > { %s1620_s6 = scalar_lea.vmem (!%p1482_p8), [#allocation2], %s982_s17  ;;  %p1839_p4 = scmp.ne.s32.totalorder (!%p1482_p8), %s1832_s24, 0 }
  0x66   : > { %1375 = dma.done.wait (%p1839_p4), %s234_s7, 4096  }
  0x67   : > { %1377 = vsyncadd (%p1839_p4), %s234_s7, 4294963200  ;;  %p1840_p5 = scmp.eq.s32.totalorder %s1463_s22, 0 }
  0x69   : > { %1379 = dma.done.wait (%p1840_p5), [#allocation6], 2048   ;;  %p1841_p8 = pmov %p1840_p5 }
  0x6a   : > { %v1228_v0 = vld [vmem:[#allocation5] sm:$0xff]   ;;  %v1229_v1 = vld [vmem:[#allocation5 + $0x8] sm:$0xff]   ;;  %v1230_v2 = vld [vmem:[#allocation5 + $0x10] sm:$0xff]   ;;  %s1708_s11 = scalar_lea.vmem [#allocation8], %s982_s17  ;;  %s1010_s28 = sshll.u32 %s1463_s22, 12 }
  0x6b   : > { %1381 = vsyncadd (%p1841_p8), [#allocation6], 4294965248  ;;  %1059 = vmatprep.subr.bf16.mxu0 %v1228_v0  ;;  %v1231_v3 = vld [vmem:[#allocation5 + $0x18] sm:$0xff]   ;;  %v275_v4 = vld [vmem:[%s1620_s6] sm:$0xff]  ;;  %s881_s30 = sshll.u32 %s1708_s11, 4  ;;  %s1773_s9 = scalar_lea.hbm %s1828_s5, %s1010_s28  ;;  %s1775_s30 = int_to_ptr.vmem [resolvable:$true] %s881_s30 }
  0x6c   : > { %1060 = vmatpush3.bf16.msra.mxu0 %v1228_v0  ;;  %v276_v5 = vld [vmem:[%s1620_s6 + $0x8] sm:$0xff]  ;;  %v1232_v7 = vld [vmem:[#allocation5 + $0x20] sm:$0xff]   ;;  %v1234_v9 = vld [vmem:[#allocation5 + $0x30] sm:$0xff]   ;;  %s868_s22 = scalar_lea.sflag [#allocation4], %s1614_s29  ;;  %s1330_s12 = scalar_lea.vmem %s1775_s30, 4096 }
  0x6d   : > { %1061 = vmatprep.subr.bf16.mxu0 %v1229_v1  ;;  %v307_v6 = vpack.c.bf16 %v276_v5, %v275_v4  ;;  %v1233_v8 = vld [vmem:[#allocation5 + $0x28] sm:$0xff]   ;;  %v1236_v10 = vld [vmem:[#allocation7] sm:$0xff]   ;;  %v1238_v12 = vld [vmem:[#allocation7 + $0x10] sm:$0xff]   ;;  %p1331_p11 = scmp.ne.s32.totalorder %s1775_s30, %s1330_s12  ;;  %p1842_p0 = scmp.ne.s32.totalorder %s1837_s23, 0 }
  0x6e   : > { %v1237_v11 = vld [vmem:[#allocation7 + $0x8] sm:$0xff]   ;;  %1107 = vmatprep.subr.bf16.mxu1 %v1236_v10  ;;  %v1235_v13 = vld [vmem:[#allocation5 + $0x38] sm:$0xff]   ;;  %v277_v14 = vld [vmem:[%s1620_s6 + $0x10] sm:$0xff]  ;;  %s1409_s13 = smov [#allocation8]  }
  0x6f   : > { %1075 = vmatprep.mubr.bf16.mxu0 %v307_v6  ;;  %1108 = vmatpush3.bf16.msra.mxu1 %v1236_v10  ;;  %v278_v15 = vld [vmem:[%s1620_s6 + $0x18] sm:$0xff]  ;;  %v279_v17 = vld [vmem:[%s1620_s6 + $0x20] sm:$0xff]  ;;  %v280_v18 = vld [vmem:[%s1620_s6 + $0x28] sm:$0xff]  ;;  %p1332_p1 = pnand %p1331_p11, %p1842_p0  ;;  %s1334_s17 = sshll.u32 %s1409_s13, 4  ;;  %s1335_s17 = int_to_ptr.vmem [resolvable:$false] %s1334_s17 }
  0x70   : > { %1062 = vmatpush3.bf16.msra.mxu0 %v1229_v1  ;;  %1109 = vmatprep.subr.bf16.mxu1 %v1237_v11  ;;  %v1239_v16 = vld [vmem:[#allocation7 + $0x18] sm:$0xff]   ;;  %v308_v19 = vpack.c.bf16 %v278_v15, %v277_v14  ;;  %v309_v20 = vpack.c.bf16 %v280_v18, %v279_v17  ;;  %v1240_v21 = vld [vmem:[#allocation7 + $0x20] sm:$0xff]   ;;  %v281_v22 = vld [vmem:[%s1620_s6 + $0x30] sm:$0xff]  ;;  %s1336_s7 = scalar_lea.vmem %s1335_s17, 8192  ;;  %p1337_p7 = scmp.lt.s32.totalorder %s1775_s30, %s1335_s17 }
  0x71   : > { %1063 = vmatprep.subr.bf16.mxu0 %v1230_v2  ;;  %v282_v23 = vld [vmem:[%s1620_s6 + $0x38] sm:$0xff]  ;;  %v1241_v24 = vld [vmem:[#allocation7 + $0x28] sm:$0xff]   ;;  %v283_v25 = vld [vmem:[%s1620_s6 + $0x40] sm:$0xff]  ;;  %p1333_p3 = pneg %p1332_p1  ;;  %p1338_p9 = scmp.lt.s32.totalorder %s1336_s7, %s1330_s12 }
  0x72   : > { %v284_v26 = vld [vmem:[%s1620_s6 + $0x48] sm:$0xff]  ;;  %v310_v27 = vpack.c.bf16 %v282_v23, %v281_v22  ;;  %v285_v29 = vld [vmem:[%s1620_s6 + $0x50] sm:$0xff]  ;;  %v286_v30 = vld [vmem:[%s1620_s6 + $0x58] sm:$0xff] }
  0x73   : > { %1110 = vmatpush3.bf16.msra.mxu1 %v1237_v11  ;;  %v311_v28 = vpack.c.bf16 %v284_v26, %v283_v25  ;;  %v287_v31 = vld [vmem:[%s1620_s6 + $0x60] sm:$0xff]  ;;  %v288_v32 = vld [vmem:[%s1620_s6 + $0x68] sm:$0xff]  ;;  %v312_v33 = vpack.c.bf16 %v286_v30, %v285_v29  ;;  %v289_v35 = vld [vmem:[%s1620_s6 + $0x70] sm:$0xff]  ;;  %p1339_p12 = por %p1338_p9, %p1337_p7 }
  0x74   : > { %1064 = vmatpush3.bf16.msra.mxu0 %v1230_v2  ;;  %1111 = vmatprep.subr.bf16.mxu1 %v1238_v12  ;;  %v313_v34 = vpack.c.bf16 %v288_v32, %v287_v31  ;;  %v290_v36 = vld [vmem:[%s1620_s6 + $0x78] sm:$0xff]  ;;  %v291_v37 = vld [vmem:[%s1620_s6 + $0x80] sm:$0xff]  ;;  %v292_v38 = vld [vmem:[%s1620_s6 + $0x88] sm:$0xff] }
  0x75   : > { %1065 = vmatprep.subr.bf16.mxu0 %v1231_v3  ;;  %v314_v39 = vpack.c.bf16 %v290_v36, %v289_v35  ;;  %v315_v40 = vpack.c.bf16 %v292_v38, %v291_v37  ;;  %v293_v41 = vld [vmem:[%s1620_s6 + $0x90] sm:$0xff]  ;;  %v294_v42 = vld [vmem:[%s1620_s6 + $0x98] sm:$0xff]  ;;  %v295_v43 = vld [vmem:[%s1620_s6 + $0xa0] sm:$0xff]  ;;  %p1340_p2 = pnand %p1339_p12, %p1333_p3 }
  0x76   : > { %v296_v44 = vld [vmem:[%s1620_s6 + $0xa8] sm:$0xff]  ;;  %v316_v45 = vpack.c.bf16 %v294_v42, %v293_v41  ;;  %v297_v47 = vld [vmem:[%s1620_s6 + $0xb0] sm:$0xff]  ;;  %v298_v48 = vld [vmem:[%s1620_s6 + $0xb8] sm:$0xff] }
  0x77   : > { %1112 = vmatpush3.bf16.msra.mxu1 %v1238_v12  ;;  %v317_v46 = vpack.c.bf16 %v296_v44, %v295_v43  ;;  %v299_v49 = vld [vmem:[%s1620_s6 + $0xc0] sm:$0xff]  ;;  %v300_v50 = vld [vmem:[%s1620_s6 + $0xc8] sm:$0xff]  ;;  %v318_v51 = vpack.c.bf16 %v298_v48, %v297_v47  ;;  %v301_v53 = vld [vmem:[%s1620_s6 + $0xd0] sm:$0xff] }
  0x78   : > { %1066 = vmatpush3.bf16.msra.mxu0 %v1231_v3  ;;  %1113 = vmatprep.subr.bf16.mxu1 %v1239_v16  ;;  %v319_v52 = vpack.c.bf16 %v300_v50, %v299_v49  ;;  %v302_v54 = vld [vmem:[%s1620_s6 + $0xd8] sm:$0xff]  ;;  %v303_v55 = vld [vmem:[%s1620_s6 + $0xe0] sm:$0xff]  ;;  %v304_v56 = vld [vmem:[%s1620_s6 + $0xe8] sm:$0xff] }
  0x79   : > { %1067 = vmatprep.subr.bf16.mxu0 %v1232_v7  ;;  %v320_v57 = vpack.c.bf16 %v302_v54, %v301_v53  ;;  %v321_v58 = vpack.c.bf16 %v304_v56, %v303_v55  ;;  %v305_v59 = vld [vmem:[%s1620_s6 + $0xf0] sm:$0xff]  ;;  %v306_v60 = vld [vmem:[%s1620_s6 + $0xf8] sm:$0xff]  ;;  %v1665_v0 = vld [vmem:[%s1825_s2] ss:$0 sm:$0xff] }
  0x7a   : > { %v322_v61 = vpack.c.bf16 %v306_v60, %v305_v59  ;;  %v1242_v62 = vld [vmem:[#allocation7 + $0x30] sm:$0xff]   ;;  %v1243_v63 = vld [vmem:[#allocation7 + $0x38] sm:$0xff]  }
  0x7b   : > { %1114 = vmatpush3.bf16.msra.mxu1 %v1239_v16 }
  0x7c   : > { %1068 = vmatpush3.bf16.msra.mxu0 %v1232_v7  ;;  %1115 = vmatprep.subr.bf16.mxu1 %v1240_v21 }
  0x7d   : > { %1069 = vmatprep.subr.bf16.mxu0 %v1233_v8 }
  0x7f   : > { %1116 = vmatpush3.bf16.msra.mxu1 %v1240_v21 }
  0x80   : > { %1070 = vmatpush3.bf16.msra.mxu0 %v1233_v8  ;;  %1117 = vmatprep.subr.bf16.mxu1 %v1241_v24 }
  0x81   : > { %1071 = vmatprep.subr.bf16.mxu0 %v1234_v9 }
  0x83   : > { %1118 = vmatpush3.bf16.msra.mxu1 %v1241_v24 }
  0x84   : > { %1072 = vmatpush3.bf16.msra.mxu0 %v1234_v9  ;;  %1119 = vmatprep.subr.bf16.mxu1 %v1242_v62 }
  0x85   : > { %1073 = vmatprep.subr.bf16.mxu0 %v1235_v13 }
  0x87   : > { %1120 = vmatpush3.bf16.msra.mxu1 %v1242_v62 }
  0x88   : > { %1074 = vmatpush3.bf16.msra.mxu0 %v1235_v13  ;;  %1121 = vmatprep.subr.bf16.mxu1 %v1243_v63 }
  0x8b   : > { %1076 = vmatmul.mubr.bf16.vlgmr.msra.gmra.mrb[0].mxu0 %v308_v19  ;;  %1122 = vmatpush3.bf16.msra.mxu1 %v1243_v63 }
  0x8c   : > { %1079 = vmatprep.mubr.bf16.mxu0 %v309_v20 }
  0x93   : > { %1080 = vmatmul.mubr.bf16.gmra.mrb[4].mxu0 %v310_v27 }
  0x94   : > { %1083 = vmatprep.mubr.bf16.mxu0 %v311_v28 }
  0x9b   : > { %1084 = vmatmul.mubr.bf16.gmra.mrb[8].mxu0 %v312_v33 }
  0x9c   : > { %1087 = vmatprep.mubr.bf16.mxu0 %v313_v34 }
  0xa3   : > { %1088 = vmatmul.mubr.bf16.gmra.mrb[12].mxu0 %v314_v39 }
  0xa4   : > { %1091 = vmatprep.mubr.bf16.mxu0 %v315_v40 }
  0xab   : > { %1092 = vmatmul.mubr.bf16.gmra.mrb[16].mxu0 %v316_v45 }
  0xac   : > { %1095 = vmatprep.mubr.bf16.mxu0 %v317_v46 }
  0xb3   : > { %1096 = vmatmul.mubr.bf16.gmra.mrb[20].mxu0 %v318_v51 }
  0xb4   : > { %1099 = vmatprep.mubr.bf16.mxu0 %v319_v52 }
  0xbb   : > { %1100 = vmatmul.mubr.bf16.gmra.mrb[24].mxu0 %v320_v57 }
  0xbc   : > { %1103 = vmatprep.mubr.bf16.mxu0 %v321_v58 }
  0xc3   : > { %1104 = vmatmul.mubr.bf16.gmra.mrb[28].mxu0 %v322_v61 }
 0x15e   : > { %v1077_v1 = vpop.f32.mrb[0].mxu0 }
 0x15f   : > { %v437_v2 = vadd.f32 %v1077_v1, %v1665_v0  ;;  %v428_v3 = vpop.f32.mrb[1].mxu0 }
 0x160   : > { %v429_v4 = vadd.f32 %v1665_v0, %v428_v3  ;;  %v1078_v5 = vpop.f32.mrb[2].mxu0 }
 0x161   : > { %v440_v6 = vadd.f32 %v1078_v5, %v1665_v0  ;;  %v431_v7 = vpop.f32.mrb[3].mxu0  ;;  %v557_v9 = vmax.f32 %v437_v2, 0.0 }
 0x162   : > { %v432_v8 = vadd.f32 %v1665_v0, %v431_v7  ;;  %v555_v11 = vmax.f32 %v429_v4, 0.0 }
 0x163   : > { %v558_v10 = vmax.f32 %v440_v6, 0.0 }
 0x164   : > { %v556_v12 = vmax.f32 %v432_v8, 0.0 }
 0x165   : > { %v588_v13 = vpack.c.bf16 %v558_v10, %v557_v9 }
 0x166   : > { %v1081_v14 = vpop.f32.mrb[4].mxu0  ;;  %v587_v15 = vpack.c.bf16 %v556_v12, %v555_v11 }
 0x167   : > { %v453_v16 = vadd.f32 %v1081_v14, %v1665_v0  ;;  %v444_v17 = vpop.f32.mrb[5].mxu0 }
 0x168   : > { %v445_v18 = vadd.f32 %v1665_v0, %v444_v17  ;;  %v1082_v19 = vpop.f32.mrb[6].mxu0  ;;  %1123 = vmatprep.mubr.bf16.mxu1 %v587_v15 }
 0x169   : > { %v456_v20 = vadd.f32 %v1082_v19, %v1665_v0  ;;  %v447_v21 = vpop.f32.mrb[7].mxu0  ;;  %1124 = vmatmul.mubr.bf16.vlgmr.msra.gmra.mrb[0].mxu1 %v588_v13  ;;  %v561_v23 = vmax.f32 %v453_v16, 0.0 }
 0x16a   : > { %v448_v22 = vadd.f32 %v1665_v0, %v447_v21  ;;  %v559_v25 = vmax.f32 %v445_v18, 0.0 }
 0x16b   : > { %v562_v24 = vmax.f32 %v456_v20, 0.0 }
 0x16c   : > { %v560_v26 = vmax.f32 %v448_v22, 0.0 }
 0x16d   : > { %v590_v27 = vpack.c.bf16 %v562_v24, %v561_v23 }
 0x16e   : > { %v589_v28 = vpack.c.bf16 %v560_v26, %v559_v25  ;;  %v1085_v29 = vpop.f32.mrb[8].mxu0 }
 0x16f   : > { %v469_v30 = vadd.f32 %v1085_v29, %v1665_v0  ;;  %v460_v31 = vpop.f32.mrb[9].mxu0 }
 0x170   : > { %v461_v32 = vadd.f32 %v1665_v0, %v460_v31  ;;  %v1086_v33 = vpop.f32.mrb[10].mxu0  ;;  %1127 = vmatprep.mubr.bf16.mxu1 %v589_v28 }
 0x171   : > { %v472_v34 = vadd.f32 %v1086_v33, %v1665_v0  ;;  %v463_v35 = vpop.f32.mrb[11].mxu0  ;;  %1128 = vmatmul.mubr.bf16.gmra.mrb[4].mxu1 %v590_v27  ;;  %v565_v37 = vmax.f32 %v469_v30, 0.0 }
 0x172   : > { %v464_v36 = vadd.f32 %v1665_v0, %v463_v35  ;;  %v563_v39 = vmax.f32 %v461_v32, 0.0 }
 0x173   : > { %v566_v38 = vmax.f32 %v472_v34, 0.0 }
 0x174   : > { %v564_v40 = vmax.f32 %v464_v36, 0.0 }
 0x175   : > { %v592_v41 = vpack.c.bf16 %v566_v38, %v565_v37 }
 0x176   : > { %v591_v42 = vpack.c.bf16 %v564_v40, %v563_v39  ;;  %v1089_v43 = vpop.f32.mrb[12].mxu0 }
 0x177   : > { %v485_v44 = vadd.f32 %v1089_v43, %v1665_v0  ;;  %v476_v45 = vpop.f32.mrb[13].mxu0 }
 0x178   : > { %v477_v46 = vadd.f32 %v1665_v0, %v476_v45  ;;  %v1090_v47 = vpop.f32.mrb[14].mxu0  ;;  %1131 = vmatprep.mubr.bf16.mxu1 %v591_v42 }
 0x179   : > { %v488_v48 = vadd.f32 %v1090_v47, %v1665_v0  ;;  %v479_v49 = vpop.f32.mrb[15].mxu0  ;;  %1132 = vmatmul.mubr.bf16.gmra.mrb[8].mxu1 %v592_v41  ;;  %v569_v51 = vmax.f32 %v485_v44, 0.0 }
 0x17a   : > { %v480_v50 = vadd.f32 %v1665_v0, %v479_v49  ;;  %v567_v53 = vmax.f32 %v477_v46, 0.0 }
 0x17b   : > { %v570_v52 = vmax.f32 %v488_v48, 0.0 }
 0x17c   : > { %v568_v54 = vmax.f32 %v480_v50, 0.0  ;;  %v1702_v50 = vld [vmem:[%s1827_s4] ss:$0 sm:$0xff] }
 0x17d   : > { %v594_v55 = vpack.c.bf16 %v570_v52, %v569_v51 }
 0x17e   : > { %v593_v56 = vpack.c.bf16 %v568_v54, %v567_v53  ;;  %v1093_v57 = vpop.f32.mrb[16].mxu0 }
 0x17f   : > { %v501_v58 = vadd.f32 %v1093_v57, %v1665_v0  ;;  %v492_v59 = vpop.f32.mrb[17].mxu0 }
 0x180   : > { %v493_v60 = vadd.f32 %v1665_v0, %v492_v59  ;;  %v1094_v61 = vpop.f32.mrb[18].mxu0  ;;  %1135 = vmatprep.mubr.bf16.mxu1 %v593_v56 }
 0x181   : > { %v504_v62 = vadd.f32 %v1094_v61, %v1665_v0  ;;  %v495_v63 = vpop.f32.mrb[19].mxu0  ;;  %1136 = vmatmul.mubr.bf16.gmra.mrb[12].mxu1 %v594_v55  ;;  %v573_v2 = vmax.f32 %v501_v58, 0.0 }
 0x182   : > { %v496_v1 = vadd.f32 %v1665_v0, %v495_v63  ;;  %v571_v4 = vmax.f32 %v493_v60, 0.0 }
 0x183   : > { %v574_v3 = vmax.f32 %v504_v62, 0.0 }
 0x184   : > { %v572_v5 = vmax.f32 %v496_v1, 0.0 }
 0x185   : > { %v596_v6 = vpack.c.bf16 %v574_v3, %v573_v2 }
 0x186   : > { %v595_v7 = vpack.c.bf16 %v572_v5, %v571_v4  ;;  %v1097_v8 = vpop.f32.mrb[20].mxu0 }
 0x187   : > { %v517_v9 = vadd.f32 %v1097_v8, %v1665_v0  ;;  %v508_v10 = vpop.f32.mrb[21].mxu0 }
 0x188   : > { %v509_v11 = vadd.f32 %v1665_v0, %v508_v10  ;;  %v1098_v12 = vpop.f32.mrb[22].mxu0  ;;  %1139 = vmatprep.mubr.bf16.mxu1 %v595_v7 }
 0x189   : > { %v520_v13 = vadd.f32 %v1098_v12, %v1665_v0  ;;  %v511_v14 = vpop.f32.mrb[23].mxu0  ;;  %1140 = vmatmul.mubr.bf16.gmra.mrb[16].mxu1 %v596_v6  ;;  %v577_v16 = vmax.f32 %v517_v9, 0.0 }
 0x18a   : > { %v512_v15 = vadd.f32 %v1665_v0, %v511_v14  ;;  %v575_v18 = vmax.f32 %v509_v11, 0.0 }
 0x18b   : > { %v578_v17 = vmax.f32 %v520_v13, 0.0 }
 0x18c   : > { %v576_v19 = vmax.f32 %v512_v15, 0.0 }
 0x18d   : > { %v598_v20 = vpack.c.bf16 %v578_v17, %v577_v16 }
 0x18e   : > { %v597_v21 = vpack.c.bf16 %v576_v19, %v575_v18  ;;  %v1101_v22 = vpop.f32.mrb[24].mxu0 }
 0x18f   : > { %v533_v23 = vadd.f32 %v1101_v22, %v1665_v0  ;;  %v524_v24 = vpop.f32.mrb[25].mxu0 }
 0x190   : > { %v525_v25 = vadd.f32 %v1665_v0, %v524_v24  ;;  %v1102_v26 = vpop.f32.mrb[26].mxu0  ;;  %1143 = vmatprep.mubr.bf16.mxu1 %v597_v21 }
 0x191   : > { %v536_v27 = vadd.f32 %v1102_v26, %v1665_v0  ;;  %v527_v28 = vpop.f32.mrb[27].mxu0  ;;  %1144 = vmatmul.mubr.bf16.gmra.mrb[20].mxu1 %v598_v20  ;;  %v581_v30 = vmax.f32 %v533_v23, 0.0 }
 0x192   : > { %v528_v29 = vadd.f32 %v1665_v0, %v527_v28  ;;  %v579_v32 = vmax.f32 %v525_v25, 0.0 }
 0x193   : > { %v582_v31 = vmax.f32 %v536_v27, 0.0 }
 0x194   : > { %v580_v33 = vmax.f32 %v528_v29, 0.0 }
 0x195   : > { %v600_v34 = vpack.c.bf16 %v582_v31, %v581_v30 }
 0x196   : > { %v599_v35 = vpack.c.bf16 %v580_v33, %v579_v32  ;;  %v1105_v36 = vpop.f32.mrb[28].mxu0 }
 0x197   : > { %v549_v37 = vadd.f32 %v1105_v36, %v1665_v0  ;;  %v540_v38 = vpop.f32.mrb[29].mxu0 }
 0x198   : > { %v541_v39 = vadd.f32 %v1665_v0, %v540_v38  ;;  %v1106_v40 = vpop.f32.mrb[30].mxu0  ;;  %1147 = vmatprep.mubr.bf16.mxu1 %v599_v35 }
 0x199   : > { %v552_v41 = vadd.f32 %v1106_v40, %v1665_v0  ;;  %v543_v42 = vpop.f32.mrb[31].mxu0  ;;  %1148 = vmatmul.mubr.bf16.gmra.mrb[24].mxu1 %v600_v34  ;;  %v585_v44 = vmax.f32 %v549_v37, 0.0 }
 0x19a   : > { %v544_v43 = vadd.f32 %v1665_v0, %v543_v42  ;;  %v583_v46 = vmax.f32 %v541_v39, 0.0 }
 0x19b   : > { %v586_v45 = vmax.f32 %v552_v41, 0.0 }
 0x19c   : > { %v584_v47 = vmax.f32 %v544_v43, 0.0 }
 0x19d   : > { %v602_v48 = vpack.c.bf16 %v586_v45, %v585_v44 }
 0x19e   : > { %v601_v49 = vpack.c.bf16 %v584_v47, %v583_v46 }
 0x1a0   : > { %1151 = vmatprep.mubr.bf16.mxu1 %v601_v49 }
 0x1a1   : > { %1152 = vmatmul.mubr.bf16.gmra.mrb[28].mxu1 %v602_v48 }
 0x23c   : > { %v1125_v51 = vpop.f32.mrb[0].mxu1 }
 0x23d   : > { %v717_v52 = vadd.f32 %v1125_v51, %v1702_v50  ;;  %v708_v53 = vpop.f32.mrb[1].mxu1 }
 0x23e   : > { %v709_v54 = vadd.f32 %v1702_v50, %v708_v53  ;;  %v1126_v0 = vpop.f32.mrb[2].mxu1 }
 0x23f   : > { %837 = vst [vmem:[%s1708_s11 + $0x10] sm:$0xff] %v717_v52  ;;  %v720_v55 = vadd.f32 %v1126_v0, %v1702_v50  ;;  %v711_v56 = vpop.f32.mrb[3].mxu1 }
 0x240   : > { %835 = vst [vmem:[%s1708_s11] sm:$0xff] %v709_v54  ;;  %v712_v57 = vadd.f32 %v1702_v50, %v711_v56 }
 0x241   : > { %838 = vst [vmem:[%s1708_s11 + $0x18] sm:$0xff] %v720_v55 }
 0x242   : > { %836 = vst [vmem:[%s1708_s11 + $0x8] sm:$0xff] %v712_v57 }
 0x244   : > { %v1129_v58 = vpop.f32.mrb[4].mxu1 }
 0x245   : > { %v733_v59 = vadd.f32 %v1129_v58, %v1702_v50  ;;  %v724_v60 = vpop.f32.mrb[5].mxu1 }
 0x246   : > { %v725_v61 = vadd.f32 %v1702_v50, %v724_v60  ;;  %v1130_v62 = vpop.f32.mrb[6].mxu1 }
 0x247   : > { %841 = vst [vmem:[%s1708_s11 + $0x30] sm:$0xff] %v733_v59  ;;  %v736_v63 = vadd.f32 %v1130_v62, %v1702_v50  ;;  %v727_v1 = vpop.f32.mrb[7].mxu1 }
 0x248   : > { %839 = vst [vmem:[%s1708_s11 + $0x20] sm:$0xff] %v725_v61  ;;  %v728_v2 = vadd.f32 %v1702_v50, %v727_v1 }
 0x249   : > { %842 = vst [vmem:[%s1708_s11 + $0x38] sm:$0xff] %v736_v63 }
 0x24a   : > { %840 = vst [vmem:[%s1708_s11 + $0x28] sm:$0xff] %v728_v2 }
 0x24c   : > { %v1133_v3 = vpop.f32.mrb[8].mxu1 }
 0x24d   : > { %v749_v4 = vadd.f32 %v1133_v3, %v1702_v50  ;;  %v740_v5 = vpop.f32.mrb[9].mxu1 }
 0x24e   : > { %v741_v6 = vadd.f32 %v1702_v50, %v740_v5  ;;  %v1134_v7 = vpop.f32.mrb[10].mxu1 }
 0x24f   : > { %845 = vst [vmem:[%s1708_s11 + $0x50] sm:$0xff] %v749_v4  ;;  %v752_v8 = vadd.f32 %v1134_v7, %v1702_v50  ;;  %v743_v9 = vpop.f32.mrb[11].mxu1 }
 0x250   : > { %843 = vst [vmem:[%s1708_s11 + $0x40] sm:$0xff] %v741_v6  ;;  %v744_v10 = vadd.f32 %v1702_v50, %v743_v9 }
 0x251   : > { %846 = vst [vmem:[%s1708_s11 + $0x58] sm:$0xff] %v752_v8 }
 0x252   : > { %844 = vst [vmem:[%s1708_s11 + $0x48] sm:$0xff] %v744_v10 }
 0x254   : > { %v1137_v11 = vpop.f32.mrb[12].mxu1 }
 0x255   : > { %v765_v12 = vadd.f32 %v1137_v11, %v1702_v50  ;;  %v756_v13 = vpop.f32.mrb[13].mxu1 }
 0x256   : > { %v757_v14 = vadd.f32 %v1702_v50, %v756_v13  ;;  %v1138_v15 = vpop.f32.mrb[14].mxu1 }
 0x257   : > { %849 = vst [vmem:[%s1708_s11 + $0x70] sm:$0xff] %v765_v12  ;;  %v768_v16 = vadd.f32 %v1138_v15, %v1702_v50  ;;  %v759_v17 = vpop.f32.mrb[15].mxu1 }
 0x258   : > { %847 = vst [vmem:[%s1708_s11 + $0x60] sm:$0xff] %v757_v14  ;;  %v760_v18 = vadd.f32 %v1702_v50, %v759_v17 }
 0x259   : > { %850 = vst [vmem:[%s1708_s11 + $0x78] sm:$0xff] %v768_v16 }
 0x25a   : > { %848 = vst [vmem:[%s1708_s11 + $0x68] sm:$0xff] %v760_v18 }
 0x25c   : > { %v1141_v19 = vpop.f32.mrb[16].mxu1 }
 0x25d   : > { %v781_v20 = vadd.f32 %v1141_v19, %v1702_v50  ;;  %v772_v21 = vpop.f32.mrb[17].mxu1 }
 0x25e   : > { %v773_v22 = vadd.f32 %v1702_v50, %v772_v21  ;;  %v1142_v23 = vpop.f32.mrb[18].mxu1 }
 0x25f   : > { %853 = vst [vmem:[%s1708_s11 + $0x90] sm:$0xff] %v781_v20  ;;  %v784_v24 = vadd.f32 %v1142_v23, %v1702_v50  ;;  %v775_v25 = vpop.f32.mrb[19].mxu1 }
 0x260   : > { %851 = vst [vmem:[%s1708_s11 + $0x80] sm:$0xff] %v773_v22  ;;  %v776_v26 = vadd.f32 %v1702_v50, %v775_v25 }
 0x261   : > { %854 = vst [vmem:[%s1708_s11 + $0x98] sm:$0xff] %v784_v24 }
 0x262   : > { %852 = vst [vmem:[%s1708_s11 + $0x88] sm:$0xff] %v776_v26 }
 0x264   : > { %v1145_v27 = vpop.f32.mrb[20].mxu1 }
 0x265   : > { %v797_v28 = vadd.f32 %v1145_v27, %v1702_v50  ;;  %v788_v29 = vpop.f32.mrb[21].mxu1 }
 0x266   : > { %v789_v30 = vadd.f32 %v1702_v50, %v788_v29  ;;  %v1146_v31 = vpop.f32.mrb[22].mxu1 }
 0x267   : > { %857 = vst [vmem:[%s1708_s11 + $0xb0] sm:$0xff] %v797_v28  ;;  %v800_v32 = vadd.f32 %v1146_v31, %v1702_v50  ;;  %v791_v33 = vpop.f32.mrb[23].mxu1 }
 0x268   : > { %855 = vst [vmem:[%s1708_s11 + $0xa0] sm:$0xff] %v789_v30  ;;  %v792_v34 = vadd.f32 %v1702_v50, %v791_v33 }
 0x269   : > { %858 = vst [vmem:[%s1708_s11 + $0xb8] sm:$0xff] %v800_v32 }
 0x26a   : > { %856 = vst [vmem:[%s1708_s11 + $0xa8] sm:$0xff] %v792_v34 }
 0x26c   : > { %v1149_v35 = vpop.f32.mrb[24].mxu1 }
 0x26d   : > { %v813_v36 = vadd.f32 %v1149_v35, %v1702_v50  ;;  %v804_v37 = vpop.f32.mrb[25].mxu1 }
 0x26e   : > { %v805_v38 = vadd.f32 %v1702_v50, %v804_v37  ;;  %v1150_v39 = vpop.f32.mrb[26].mxu1 }
 0x26f   : > { %861 = vst [vmem:[%s1708_s11 + $0xd0] sm:$0xff] %v813_v36  ;;  %v816_v40 = vadd.f32 %v1150_v39, %v1702_v50  ;;  %v807_v41 = vpop.f32.mrb[27].mxu1 }
 0x270   : > { %859 = vst [vmem:[%s1708_s11 + $0xc0] sm:$0xff] %v805_v38  ;;  %v808_v42 = vadd.f32 %v1702_v50, %v807_v41 }
 0x271   : > { %862 = vst [vmem:[%s1708_s11 + $0xd8] sm:$0xff] %v816_v40 }
 0x272   : > { %860 = vst [vmem:[%s1708_s11 + $0xc8] sm:$0xff] %v808_v42 }
 0x274   : > { %v1153_v43 = vpop.f32.mrb[28].mxu1 }
 0x275   : > { %v829_v44 = vadd.f32 %v1153_v43, %v1702_v50  ;;  %v820_v45 = vpop.f32.mrb[29].mxu1 }
 0x276   : > { %v821_v46 = vadd.f32 %v1702_v50, %v820_v45  ;;  %v1154_v47 = vpop.f32.mrb[30].mxu1 }
 0x277   : > { %865 = vst [vmem:[%s1708_s11 + $0xf0] sm:$0xff] %v829_v44  ;;  %v832_v48 = vadd.f32 %v1154_v47, %v1702_v50  ;;  %v823_v49 = vpop.f32.mrb[31].mxu1 }
 0x278   : > { %863 = vst [vmem:[%s1708_s11 + $0xe0] sm:$0xff] %v821_v46  ;;  %v824_v51 = vadd.f32 %v1702_v50, %v823_v49 }
 0x279   : > { %866 = vst [vmem:[%s1708_s11 + $0xf8] sm:$0xff] %v832_v48 }
 0x27a   : > { %864 = vst [vmem:[%s1708_s11 + $0xe8] sm:$0xff] %v824_v51 }
 0x27b   : > { %1343 = shalt.err (!%p1340_p2)
}
 0x27c   : > { %s1344_s6 = scalar_lea.hbm %s1773_s9, 4096  ;;  %s1348_s8 = scalar_lea.hbm %s1828_s5, 8192 }
 0x27d   : > { %p1345_p13 = scmp.ne.s32.totalorder %s1773_s9, %s1344_s6  ;;  %p1349_p4 = scmp.lt.u32.totalorder %s1773_s9, %s1828_s5 }
 0x27e   : > { %p1350_p5 = scmp.lt.u32.totalorder %s1348_s8, %s1344_s6  ;;  %p1352_p11 = scmp.lt.u32.totalorder %s1344_s6, %s1773_s9 }
 0x27f   : > { %p1346_p6 = pnand %p1345_p13, %p1842_p0 }
 0x280   : > { %p1351_p8 = por %p1350_p5, %p1349_p4 }
 0x281   : > { %p1347_p10 = pneg %p1346_p6 }
 0x282   : > { %p1353_p1 = por %p1352_p11, %p1351_p8 }
 0x284   : > { %p1354_p3 = pnand %p1353_p1, %p1347_p10 }
 0x286   : > { %1357 = shalt.err (!%p1354_p3)
}
 0x287   : > { %s1410_s28 = smov 128   ;;  %s1411_s15 = smov 8  }
 0x288   : > { %1165 = dma.vmem_to_hbm [thread:$0]  (%p1842_p0), %s1775_s30, 4096, %s1773_s9, %s868_s22, %s1410_s28, %s1410_s28, %s1411_s15  }
 0x289 PF: > { %s896_s16 = sand.u32 1, %s1388_s18   ;;  %p1843_p7 = scmp.ne.s32.totalorder %s1833_s25, 0 }
 0x28a   : > { %p1844_p9 = scmp.ge.s32.totalorder %s1400_s21, 2  ;;  %s897_s12 = scalar_lea.sflag [#allocation4], %s896_s16 }
 0x28c   : > { %p1179_p12 = pnand %p1844_p9, %p1843_p7 }
 0x28e   : > { %1383 = dma.done.wait (!%p1179_p12), %s897_s12, 4096  }
 0x28f   : > { %1385 = vsyncadd (!%p1179_p12), %s897_s12, 4294963200  ;;  %p19_p2 = scmp.ge.s32.totalorder %s1552_s14, 4   ;;  %s1845_s18 = smov %s1392_s19 }
 0x290   : > { %s1846_s19 = smov %s1396_s20  ;;  %s1847_s20 = smov %s1568_s27 }
 0x291   : > { %s1848_s21 = smov %s1552_s14  ;;  %21 = sbr.rel (!%p19_p2) target bundleno = 6 (0x6), region = 93 }
 0x298   :  { %902 = vsyncpa [#allocation3], 1 }
 0x299   :  { %904 = vsyncpa [#allocation3 + $0x1], 1 }
 0x29a   :  { %905 = vsyncpa [#allocation6], 1 }
 0x29b   :  { %906 = vsyncpa [#allocation4], 1 }
 0x29c   :  { %908 = vsyncpa [#allocation4 + $0x1], 1 }

</bundles_post_ra>
